<compile_context>
chip_gen: v5e
topology: v5e:2x2
jax: 0.10.0
libtpu: 0.0.40
codegen_flags: <defaults>
</compile_context>

<pallas_src>
import jax
import jax.numpy as jnp
from jax.experimental import pallas as pl
from jax.experimental.pallas import tpu as pltpu


def _stats_kernel(x_ref, w_ref, psum_ref, psq_ref):
    """relu + fused (block-diagonal) 1x1 conv; accumulate per-channel sum and
    sum-of-squares over the H-tile axis.  One partial row per batch element."""
    @pl.when(pl.program_id(1) == 0)
    def _():
        psum_ref[...] = jnp.zeros_like(psum_ref)
        psq_ref[...] = jnp.zeros_like(psq_ref)

    x = jnp.maximum(x_ref[...], 0.0)               # (1, TH, Wo, 2*Cin)
    _, th, wo, c2 = x.shape
    xf = x.reshape(th * wo, c2)                    # leading-dim collapse: free
    y = jnp.dot(xf, w_ref[...], preferred_element_type=jnp.float32)  # (TH*Wo, Cout)
    psum_ref[...] += jnp.sum(y, axis=0, keepdims=True).reshape(1, 1, -1)
    psq_ref[...] += jnp.sum(y * y, axis=0, keepdims=True).reshape(1, 1, -1)


def _conv_bn_kernel(x_ref, w_ref, scale_ref, shift_ref, o_ref):
    """relu + fused 1x1 conv + folded BatchNorm (y * scale + shift); single write
    of the final (channels-last) output tile — no pre-BN tensor in HBM."""
    x = jnp.maximum(x_ref[...], 0.0)               # (1, TH, Wo, 2*Cin)
    _, th, wo, c2 = x.shape
    xf = x.reshape(th * wo, c2)
    y = jnp.dot(xf, w_ref[...], preferred_element_type=jnp.float32)  # (TH*Wo, Cout)
    y = y * scale_ref[...] + shift_ref[...]        # broadcast (1, Cout)
    o_ref[...] = y.reshape(1, th, wo, -1).astype(o_ref.dtype)


def _pick_tile_rows(ho, wo, c2, cout, budget_bytes=8 * 1024 * 1024):
    """Largest divisor of Ho whose (double-buffered) input+output block fits budget."""
    per_row = wo * (c2 + cout) * 4 * 2             # f32, x2 double buffering
    th = max(1, min(ho, budget_bytes // max(per_row, 1)))
    while ho % th:
        th -= 1
    return th


def factorized_reduce(x_nchw, w1, w2, gamma, beta, eps=1e-5):
    """x_nchw: (N, Cin, H, W) f32; w1/w2: (Cout//2, Cin) 1x1-conv weights (squeezed);
    gamma/beta: (Cout,).  Returns (N, Cout, H//2, W//2), NCHW, training-mode BN."""
    N, Cin, H, W = x_nchw.shape
    assert H % 2 == 0 and W % 2 == 0, "FactorizedReduce assumes even spatial dims"
    Ch = w1.shape[0]
    Cout = 2 * Ch
    Ho, Wo = H // 2, W // 2
    C2 = 2 * Cin

    x = x_nchw.astype(jnp.float32)
    # Single fused gather: even/even and odd/odd planes stacked along channels, NHWC.
    x_cat = jnp.concatenate([x[:, :, 0::2, 0::2], x[:, :, 1::2, 1::2]], axis=1)
    x_cat = jnp.transpose(x_cat, (0, 2, 3, 1))     # (N, Ho, Wo, 2*Cin)

    # Block-diagonal fused weight: columns [:Ch] = branch1, [Ch:] = branch2.
    w_cat = jnp.zeros((C2, Cout), jnp.float32)
    w_cat = w_cat.at[:Cin, :Ch].set(w1.T.astype(jnp.float32))
    w_cat = w_cat.at[Cin:, Ch:].set(w2.T.astype(jnp.float32))

    TH = _pick_tile_rows(Ho, Wo, C2, Cout)
    nH = Ho // TH
    cparams_stats = pltpu.CompilerParams(
        dimension_semantics=("parallel", "arbitrary"),
        vmem_limit_bytes=32 * 1024 * 1024,
    )
    cparams_out = pltpu.CompilerParams(
        dimension_semantics=("parallel", "parallel"),
        vmem_limit_bytes=32 * 1024 * 1024,
    )

    # ---- Pass 1: per-batch partial sums / sums-of-squares (no pre-BN tensor kept).
    psum, psq = pl.pallas_call(
        _stats_kernel,
        out_shape=(
            jax.ShapeDtypeStruct((N, 1, Cout), jnp.float32),
            jax.ShapeDtypeStruct((N, 1, Cout), jnp.float32),
        ),
        grid_spec=pltpu.PrefetchScalarGridSpec(
            num_scalar_prefetch=0,
            grid=(N, nH),
            in_specs=[
                pl.BlockSpec((1, TH, Wo, C2), lambda n, h: (n, h, 0, 0)),
                pl.BlockSpec((C2, Cout), lambda n, h: (0, 0)),
            ],
            out_specs=(
                pl.BlockSpec((1, 1, Cout), lambda n, h: (n, 0, 0)),
                pl.BlockSpec((1, 1, Cout), lambda n, h: (n, 0, 0)),
            ),
        ),
        compiler_params=cparams_stats,
    )(x_cat, w_cat)

    # ---- Tiny reduction + BN folding (scalar glue). Training-mode BatchNorm2d:
    # biased variance over (N, H, W); running-stats update is a PyTorch side effect
    # not reflected in the returned tensor.
    count = float(N * Ho * Wo)
    s = jnp.sum(psum, axis=(0, 1))                              # (Cout,)
    sq = jnp.sum(psq, axis=(0, 1))                              # (Cout,)
    mean = s / count
    var = jnp.maximum(sq / count - mean * mean, 0.0)            # clamp: no negative var
    inv_std = jax.lax.rsqrt(var + eps)
    g = gamma.astype(jnp.float32)
    b = beta.astype(jnp.float32)
    scale = (g * inv_std).reshape(1, Cout)
    shift = (b - mean * g * inv_std).reshape(1, Cout)

    # ---- Pass 2: recompute conv, apply folded BN, single write of the output.
    out_nhwc = pl.pallas_call(
        _conv_bn_kernel,
        out_shape=jax.ShapeDtypeStruct((N, Ho, Wo, Cout), jnp.float32),
        grid_spec=pltpu.PrefetchScalarGridSpec(
            num_scalar_prefetch=0,
            grid=(N, nH),
            in_specs=[
                pl.BlockSpec((1, TH, Wo, C2), lambda n, h: (n, h, 0, 0)),
                pl.BlockSpec((C2, Cout), lambda n, h: (0, 0)),
                pl.BlockSpec((1, Cout), lambda n, h: (0, 0)),
                pl.BlockSpec((1, Cout), lambda n, h: (0, 0)),
            ],
            out_specs=pl.BlockSpec((1, TH, Wo, Cout), lambda n, h: (n, h, 0, 0)),
        ),
        compiler_params=cparams_out,
    )(x_cat, w_cat, scale, shift)

    return jnp.transpose(out_nhwc, (0, 3, 1, 2))   # back to NCHW


def _reference(x, w1, w2, gamma, beta, eps=1e-5):
    """Pure-JAX reference of the PyTorch forward (NCHW, training-mode BN)."""
    xr = jnp.maximum(x, 0.0)
    b1 = jnp.einsum("nchw,oc->nohw", xr[:, :, 0::2, 0::2], w1)
    b2 = jnp.einsum("nchw,oc->nohw", xr[:, :, 1::2, 1::2], w2)
    y = jnp.concatenate([b1, b2], axis=1)
    mean = y.mean(axis=(0, 2, 3), keepdims=True)
    var = y.var(axis=(0, 2, 3), keepdims=True)      # biased, like PyTorch BN
    yn = (y - mean) * jax.lax.rsqrt(var + eps)
    return yn * gamma.reshape(1, -1, 1, 1) + beta.reshape(1, -1, 1, 1)


if __name__ == "__main__":
    N, Cin, H, W = 2, 4, 16, 16
    Cout = 8                      # out_planes; each branch produces Cout // 2

    key = jax.random.PRNGKey(0)
    kx, k1, k2 = jax.random.split(key, 3)
    x = jax.random.normal(kx, (N, Cin, H, W), dtype=jnp.float32)
    # Conv2d(in, out//2, 1, stride=2, bias=False) weight: (Cout//2, Cin, 1, 1) -> squeezed
    w1 = jax.random.normal(k1, (Cout // 2, Cin), dtype=jnp.float32) * 0.1
    w2 = jax.random.normal(k2, (Cout // 2, Cin), dtype=jnp.float32) * 0.1
    # BatchNorm2d(affine=True) default init: weight=1, bias=0
    gamma = jnp.ones((Cout,), dtype=jnp.float32)
    beta = jnp.zeros((Cout,), dtype=jnp.float32)

    out = jax.block_until_ready(factorized_reduce(x, w1, w2, gamma, beta))
    ref = jax.block_until_ready(_reference(x, w1, w2, gamma, beta))

    assert out.shape == (N, Cout, H // 2, W // 2), out.shape
    if not jnp.allclose(out, ref, atol=1e-4, rtol=1e-4):
        raise AssertionError("Pallas FactorizedReduce mismatch vs reference")
    print("KERNEL_OK")
</pallas_src>

<mosaic_0001>
module attributes {stable_mosaic.version = 11 : i64} {
  func.func @_stats_kernel(%arg0: i32, %arg1: i32, %arg2: memref<1x8x8x8xf32, #tpu.memory_space<vmem>>, %arg3: memref<8x8xf32, #tpu.memory_space<vmem>>, %arg4: memref<1x1x8xf32, #tpu.memory_space<vmem>>, %arg5: memref<1x1x8xf32, #tpu.memory_space<vmem>>) attributes {dimension_semantics = [#tpu.dimension_semantics<parallel>, #tpu.dimension_semantics<arbitrary>], iteration_bounds = array<i64: 2, 1>, scalar_prefetch = 0 : i64, scratch_operands = 0 : i64, tpu.core_type = #tpu.core_type<tc>, window_params = [{transform_indices = @transform_0, window_bounds = array<i64: 1, 8, 8, 8>}, {pipeline_mode = #tpu.pipeline_mode<synchronous>, transform_indices = @transform_1, window_bounds = array<i64: 8, 8>}, {transform_indices = @transform_2, window_bounds = array<i64: 1, 1, 8>}, {transform_indices = @transform_3, window_bounds = array<i64: 1, 1, 8>}]} {
    %c0_i32 = arith.constant 0 : i32
    %0 = arith.cmpi eq, %arg1, %c0_i32 : i32
    %1 = arith.extui %0 : i1 to i32
    %c0_i32_0 = arith.constant 0 : i32
    %2 = arith.cmpi ne, %1, %c0_i32_0 : i32
    scf.if %2 {
      %cst_21 = arith.constant 0.000000e+00 : f32
      %22 = vector.broadcast %cst_21 : f32 to vector<1x1x8xf32>
      %c0_22 = arith.constant 0 : index
      %c0_23 = arith.constant 0 : index
      %c0_24 = arith.constant 0 : index
      %23 = vector.load %arg4[%c0_22, %c0_23, %c0_24] : memref<1x1x8xf32, #tpu.memory_space<vmem>>, vector<1x1x8xf32>
      tpu.vector_store %arg4[%c0_22, %c0_23, %c0_24], %22 {strides = array<i32>} : memref<1x1x8xf32, #tpu.memory_space<vmem>>, vector<1x1x8xf32>,
      %cst_25 = arith.constant 0.000000e+00 : f32
      %24 = vector.broadcast %cst_25 : f32 to vector<1x1x8xf32>
      %c0_26 = arith.constant 0 : index
      %c0_27 = arith.constant 0 : index
      %c0_28 = arith.constant 0 : index
      %25 = vector.load %arg5[%c0_26, %c0_27, %c0_28] : memref<1x1x8xf32, #tpu.memory_space<vmem>>, vector<1x1x8xf32>
      tpu.vector_store %arg5[%c0_26, %c0_27, %c0_28], %24 {strides = array<i32>} : memref<1x1x8xf32, #tpu.memory_space<vmem>>, vector<1x1x8xf32>,
    } else {
    }
    %c0 = arith.constant 0 : index
    %c0_1 = arith.constant 0 : index
    %c0_2 = arith.constant 0 : index
    %c0_3 = arith.constant 0 : index
    %3 = vector.load %arg2[%c0, %c0_1, %c0_2, %c0_3] : memref<1x8x8x8xf32, #tpu.memory_space<vmem>>, vector<1x8x8x8xf32>
    %cst = arith.constant 0.000000e+00 : f32
    %4 = vector.broadcast %cst : f32 to vector<1x8x8x8xf32>
    %5 = arith.maximumf %3, %4 : vector<1x8x8x8xf32>
    %6 = vector.shape_cast %5 : vector<1x8x8x8xf32> to vector<64x8xf32>
    %c0_4 = arith.constant 0 : index
    %c0_5 = arith.constant 0 : index
    %7 = vector.load %arg3[%c0_4, %c0_5] : memref<8x8xf32, #tpu.memory_space<vmem>>, vector<8x8xf32>
    %cst_6 = arith.constant dense<0.000000e+00> : vector<64x8xf32>
    %8 = tpu.matmul %6, %7, %cst_6 {dimension_numbers = #tpu.dot_dimension_numbers<[1], [0], [0], [1], [0, 0, 1, 1], [], []>} : vector<64x8xf32>, vector<8x8xf32>, vector<64x8xf32> -> vector<64x8xf32>
    %c0_7 = arith.constant 0 : index
    %c0_8 = arith.constant 0 : index
    %c0_9 = arith.constant 0 : index
    %9 = vector.load %arg4[%c0_7, %c0_8, %c0_9] : memref<1x1x8xf32, #tpu.memory_space<vmem>>, vector<1x1x8xf32>
    %cst_10 = arith.constant dense<0.000000e+00> : vector<8xf32>
    %10 = vector.multi_reduction <add>, %8, %cst_10 [0] : vector<64x8xf32> to vector<8xf32>
    %11 = vector.shape_cast %10 : vector<8xf32> to vector<1x8xf32>
    %12 = vector.shape_cast %11 : vector<1x8xf32> to vector<1x1x8xf32>
    %13 = arith.addf %9, %12 : vector<1x1x8xf32>
    %c0_11 = arith.constant 0 : index
    %c0_12 = arith.constant 0 : index
    %c0_13 = arith.constant 0 : index
    %14 = vector.load %arg4[%c0_11, %c0_12, %c0_13] : memref<1x1x8xf32, #tpu.memory_space<vmem>>, vector<1x1x8xf32>
    tpu.vector_store %arg4[%c0_11, %c0_12, %c0_13], %13 {strides = array<i32>} : memref<1x1x8xf32, #tpu.memory_space<vmem>>, vector<1x1x8xf32>,
    %c0_14 = arith.constant 0 : index
    %c0_15 = arith.constant 0 : index
    %c0_16 = arith.constant 0 : index
    %15 = vector.load %arg5[%c0_14, %c0_15, %c0_16] : memref<1x1x8xf32, #tpu.memory_space<vmem>>, vector<1x1x8xf32>
    %16 = arith.mulf %8, %8 : vector<64x8xf32>
    %cst_17 = arith.constant dense<0.000000e+00> : vector<8xf32>
    %17 = vector.multi_reduction <add>, %16, %cst_17 [0] : vector<64x8xf32> to vector<8xf32>
    %18 = vector.shape_cast %17 : vector<8xf32> to vector<1x8xf32>
    %19 = vector.shape_cast %18 : vector<1x8xf32> to vector<1x1x8xf32>
    %20 = arith.addf %15, %19 : vector<1x1x8xf32>
    %c0_18 = arith.constant 0 : index
    %c0_19 = arith.constant 0 : index
    %c0_20 = arith.constant 0 : index
    %21 = vector.load %arg5[%c0_18, %c0_19, %c0_20] : memref<1x1x8xf32, #tpu.memory_space<vmem>>, vector<1x1x8xf32>
    tpu.vector_store %arg5[%c0_18, %c0_19, %c0_20], %20 {strides = array<i32>} : memref<1x1x8xf32, #tpu.memory_space<vmem>>, vector<1x1x8xf32>,
    return
  }
  func.func @transform_0(%arg0: i32, %arg1: i32) -> (i32, i32, i32, i32) {
    %c0_i32 = arith.constant 0 : i32
    %c0_i32_0 = arith.constant 0 : i32
    %c0_i32_1 = arith.constant 0 : i32
    return %arg0, %arg1, %c0_i32, %c0_i32_0 : i32, i32, i32, i32
  }
  func.func @transform_1(%arg0: i32, %arg1: i32) -> (i32, i32) {
    %c0_i32 = arith.constant 0 : i32
    %c0_i32_0 = arith.constant 0 : i32
    %c0_i32_1 = arith.constant 0 : i32
    return %c0_i32, %c0_i32_0 : i32, i32
  }
  func.func @transform_2(%arg0: i32, %arg1: i32) -> (i32, i32, i32) {
    %c0_i32 = arith.constant 0 : i32
    %c0_i32_0 = arith.constant 0 : i32
    %c0_i32_1 = arith.constant 0 : i32
    return %arg0, %c0_i32, %c0_i32_0 : i32, i32, i32
  }
  func.func @transform_3(%arg0: i32, %arg1: i32) -> (i32, i32, i32) {
    %c0_i32 = arith.constant 0 : i32
    %c0_i32_0 = arith.constant 0 : i32
    %c0_i32_1 = arith.constant 0 : i32
    return %arg0, %c0_i32, %c0_i32_0 : i32, i32, i32
  }
}

</mosaic_0001>

<bundles_post_ra>
// kernel: tpu_custom_call.1
= control target key start
LH: loop header
LB: loop body
LE: loop exit
PB: predicated region body
PF: predicated region fallthrough
CT: control target
= control target key end

     0   :  { %s1055_s0 = inlined_call_operand.hbm [shape: f32[2,8,8,8], index: 0, kind: input, shape index: {}]   ;;  %s1056_s1 = inlined_call_operand.hbm [shape: f32[8,8], index: 1, kind: input, shape index: {}]   ;;  %s1057_s2 = inlined_call_operand.hbm [shape: f32[2,1,8], index: 2, kind: output, shape index: {0}]   ;;  %s1058_s3 = inlined_call_operand.hbm [shape: f32[2,1,8], index: 3, kind: output, shape index: {1}]  }
   0x1   :  { %1059 = sst [smem:[#allocation14_spill]] %s1056_s1 }
   0x2   :  { %9 = vsyncpa [#allocation3], 0 }
   0x3   :  { %11 = vsyncpa [#allocation3 + $0x1], 0 }
   0x4   :  { %12 = vsyncpa [#allocation6], 0 }
   0x5   :  { %13 = vsyncpa [#allocation4], 0 }
   0x6   :  { %15 = vsyncpa [#allocation4 + $0x1], 0 }
   0x7   :  { %16 = vsyncpa [#allocation9], 0 }
   0x8   :  { %18 = vsyncpa [#allocation9 + $0x1], 0  ;;  %s834_s12 = smov 0   ;;  %s836_s13 = smov 0  }
   0x9   :  { %s838_s14 = smov 0   ;;  %s840_s15 = smov 0  }
   0xa   :  { %s842_s16 = smov 0   ;;  %s844_s17 = smov 0  }
   0xb LB: > { %s524_s18 = sadd.s32 4294967295, %s808_s17   ;;  %s525_s19 = sadd.s32 4294967294, %s808_s17   ;;  %s808_s17 = sphi %s844_s17, %s24_s17   ;;  %s804_s16 = sphi %s842_s16, %s1072_s16   ;;  %s800_s15 = sphi %s840_s15, %s1071_s15   ;;  %s796_s14 = sphi %s838_s14, %s1070_s14   ;;  %s792_s13 = sphi %s836_s13, %s1069_s13   ;;  %s788_s12 = sphi %s834_s12, %s1068_s12  }
   0xc   : > { %s45_s20 = sadd.s32 1, %s796_s14  ;;  %p52_p0 = scmp.ne.s32.totalorder %s796_s14, %s792_s13 }
   0xd   : > { %p53_p1 = scmp.eq.s32.totalorder %s808_s17, 0  ;;  %p58_p2 = scmp.ne.s32.totalorder %s792_s13, %s788_s12 }
   0xe   : > { %p872_p3 = scmp.eq.s32.totalorder %s524_s18, 0  ;;  %p103_p4 = scmp.eq.s32.totalorder %s524_s18, 1 }
   0xf   : > { %p876_p5 = por %p53_p1, %p52_p0  ;;  %p109_p6 = scmp.eq.s32.totalorder %s525_s19, 1 }
  0x10   : > { %p882_p7 = por %p872_p3, %p58_p2  ;;  %p886_p8 = por %p103_p4, %p52_p0 }
  0x11   : > { %p890_p9 = por %p109_p6, %p58_p2  ;;  %p526_p10 = scmp.ge.s32.totalorder %s808_s17, 1 }
  0x12   : > { %p142_p11 = scmp.lt.s32.totalorder %s808_s17, 3  ;;  %s1065_s1 = sld [smem:[#allocation14_spill]] }
  0x13   : > { %s810_s30 = smov [#allocation5]   ;;  %p528_p13 = scmp.ge.s32.totalorder %s808_s17, 2 }
  0x14   : > { %p899_p12 = pnand %p526_p10, %p142_p11  ;;  %s156_s4 = sshll.u32 %s810_s30, 4  ;;  %s157_s4 = int_to_ptr.vmem [resolvable:$true] %s156_s4 }
  0x15   : > { %p575_p1 = scmp.lt.s32.totalorder %s808_s17, 2  ;;  %s36_s6 = sadd.s32 1, %s804_s16 }
  0x16   : > { %p559_p0 = pneg %p899_p12  ;;  %p38_p6 = scmp.ge.s32.totalorder %s36_s6, 2 }
  0x17   : > { %p911_p4 = pnand %p575_p1, %p876_p5  ;;  %s167_s7 = sand.u32 1, %s796_s14  }
  0x18   : > { %s154_s28 = sshll.u32 %s1065_s1, 4  ;;  %p560_p2 = pnand %p559_p0, %p872_p3  ;;  %s155_s28 = int_to_ptr.hbm [resolvable:$true] %s154_s28 }
  0x19   : > { %s1074_s6 = smov (%p38_p6, %s36_s6), 0  ;;  %s529_s8 = sshll.u32 %s167_s7, 6 }
  0x1a   : > { %562 = dma.hbm_to_vmem [thread:$0]  (!%p560_p2), %s155_s28, 128, %s157_s4, [#allocation6]  }
  0x1b   : > { %s40_s9 = ssub.s32 %s804_s16, %s1074_s6  ;;  %s545_s10 = sshll.u32 %s804_s16, 6 }
  0x1c   : > { %p43_p10 = scmp.eq.s32.totalorder %s40_s9, 0  ;;  %s178_s19 = scalar_lea.hbm %s1055_s0, %s545_s10 }
  0x1d   : > { %s171_s22 = scalar_lea.vmem [#allocation2], %s529_s8  ;;  %s179_s30 = sshll.u32 %s178_s19, 4  ;;  %s180_s30 = int_to_ptr.hbm [resolvable:$true] %s179_s30 }
  0x1e   : > { %s181_s26 = sshll.u32 %s171_s22, 4  ;;  %s168_s28 = scalar_lea.sflag [#allocation3], %s167_s7  ;;  %s182_s26 = int_to_ptr.vmem [resolvable:$true] %s181_s26 }
  0x1f   : > { %s928_s27 = scalar_select %p43_p10, %s796_s14, %s45_s20  }
  0x20   : > { %s811_s4 = smov 128   ;;  %s812_s1 = smov 8  }
  0x21   : > { %566 = dma.hbm_to_vmem [thread:$0]  (!%p911_p4), %s180_s30, 1024, %s182_s26, %s168_s28, %s811_s4, %s811_s4, %s812_s1  }
  0x22   : > { %193 = sbr.rel (%p899_p12) target bundleno = 224 (0xe0), region = 28  ;;  %s935_s9 = sand.u32 (!%p899_p12), 1, %s792_s13  }
  0x23   : > { %s533_s8 = sshll.u32 (!%p899_p12), %s935_s9, 6  ;;  %s196_s20 = scalar_lea.sflag (!%p899_p12), [#allocation3], %s935_s9 }
  0x24   : > { %s199_s10 = scalar_lea.vmem (!%p899_p12), [#allocation2], %s533_s8 }
  0x27   : > { %771 = dma.done.wait (%p882_p7), %s196_s20, 1024  }
  0x28   : > { %773 = vsyncadd (%p882_p7), %s196_s20, 4294966272 }
  0x29   : > { %775 = dma.done.wait (%p872_p3), [#allocation6], 128  }
  0x2a   : > { %777 = vsyncadd (%p872_p3), [#allocation6], 4294967168  ;;  %v255_v0 = vld [vmem:[#allocation5] sm:$0xff]  ;;  %vm256_vm0 = vcmask 64512   ;;  %v241_v5 = vld [vmem:[%s199_s10 + $0x10] sm:$0xff]  ;;  %vm236_vm1 = vcmask 57344   ;;  %s392_s5 = scalar_lea.hbm %s1057_s2, %s800_s15  ;;  %s405_s18 = scalar_lea.hbm %s1058_s3, %s800_s15 }
  0x2b   : > { %v239_v1 = vld [vmem:[%s199_s10] sm:$0xff]  ;;  %296 = vmatpush.msra.mxu0 %v255_v0  ;;  %547 = vmatpush.msra.mxu2 %v255_v0  ;;  %v245_v6 = vld [vmem:[%s199_s10 + $0x30] sm:$0xff]  ;;  %v249_v7 = vmax.f32 %v241_v5, 0.0  ;;  %v240_v9 = vld [vmem:[%s199_s10 + $0x8] sm:$0xff]  ;;  %s956_s1 = scalar_lea.vmem [#allocation7], %s935_s9  ;;  %v813_v17 = vmov 0.0  }
  0x2c   : > { %v243_v2 = vld [vmem:[%s199_s10 + $0x20] sm:$0xff]  ;;  %v247_v3 = vmax.f32 %v239_v1, 0.0  ;;  %546 = vmatpush.msra.mxu1 %v255_v0  ;;  %548 = vmatpush.msra.mxu3 %v255_v0  ;;  %v253_v8 = vmax.f32 %v245_v6, 0.0  ;;  %v244_v10 = vld [vmem:[%s199_s10 + $0x28] sm:$0xff]  ;;  %v242_v11 = vld [vmem:[%s199_s10 + $0x18] sm:$0xff]  ;;  %v248_v13 = vmax.f32 %v240_v9, 0.0 }
  0x2d   : > { %v251_v4 = vmax.f32 %v243_v2, 0.0  ;;  %537 = vmatmul.msk.f32.vlgmr.msra.gmra.mxu1 %vm256_vm0, %v249_v7  ;;  %v246_v12 = vld [vmem:[%s199_s10 + $0x38] sm:$0xff]  ;;  %v252_v14 = vmax.f32 %v244_v10, 0.0  ;;  %v250_v15 = vmax.f32 %v242_v11, 0.0  ;;  %237 = vst.msk [vmem:[%s956_s1] sm:$0x1] %vm236_vm1, %v813_v17 }
  0x2e   : > { %535 = vmatmul.msk.f32.vlgmr.msra.gmra.mxu0 %vm256_vm0, %v247_v3  ;;  %541 = vmatmul.msk.f32.vlgmr.msra.gmra.mxu3 %vm256_vm0, %v253_v8  ;;  %v254_v16 = vmax.f32 %v246_v12, 0.0  ;;  %s961_s21 = scalar_lea.vmem [#allocation8], %s935_s9  ;;  %s394_s19 = sshll.u32 %s956_s1, 4  ;;  %s395_s19 = int_to_ptr.vmem [resolvable:$true] %s394_s19 }
  0x2f   : > { %539 = vmatmul.msk.f32.vlgmr.msra.gmra.mxu2 %vm256_vm0, %v251_v4  ;;  %238 = vst.msk [vmem:[%s961_s21] sm:$0x1] %vm236_vm1, %v813_v17  ;;  %s991_s22 = sshll.u32 %s392_s5, 4  ;;  %s407_s26 = sshll.u32 %s961_s21, 4  ;;  %s397_s22 = int_to_ptr.hbm [resolvable:$true] %s991_s22  ;;  %s1000_s26 = int_to_ptr.vmem [resolvable:$true] %s407_s26 }
  0x30   : > { %s995_s30 = sshll.u32 %s405_s18, 4  ;;  %s380_s15 = scalar_lea.sflag [#allocation4], %s935_s9  ;;  %s410_s30 = int_to_ptr.hbm [resolvable:$true] %s995_s30 }
  0x31   : > { %s704_s28 = sshra.s32 %s397_s22, 4  ;;  %s710_s10 = scalar_lea.hbm %s1057_s2, 2  ;;  %s705_s28 = int_to_ptr.hbm [resolvable:$true] %s704_s28 }
  0x32   : > { %s706_s4 = scalar_lea.hbm %s705_s28, 1  ;;  %p711_p11 = scmp.lt.s32.totalorder %s705_s28, %s1057_s2 }
  0x33   : > { %p707_p3 = scmp.ne.s32.totalorder %s705_s28, %s706_s4  ;;  %p712_p12 = scmp.lt.s32.totalorder %s710_s10, %s706_s4 }
  0x34   : > { %v322_v9 = vld [vmem:[%s956_s1] sm:$0x1] }
  0x35   : > { %538 = vmatmul.msk.f32.gmra.mxu1 %vm256_vm0, %v250_v15  ;;  %p708_p5 = pnand %p707_p3, %p886_p8  ;;  %p713_p0 = por %p712_p12, %p711_p11 }
  0x36   : > { %536 = vmatmul.msk.f32.gmra.mxu0 %vm256_vm0, %v248_v13  ;;  %542 = vmatmul.msk.f32.gmra.mxu3 %vm256_vm0, %v254_v16  ;;  %v347_v12 = vld [vmem:[%s961_s21] sm:$0x1] }
  0x37   : > { %540 = vmatmul.msk.f32.gmra.mxu2 %vm256_vm0, %v252_v14  ;;  %p709_p7 = pneg %p708_p5 }
  0x39   : > { %p714_p1 = pnand %p713_p0, %p709_p7 }
  0xaa   : > { %v304_v19 = vpop.f32.mrf.mxu1 }
  0xab   : > { %v298_v18 = vpop.f32.mrf.mxu0  ;;  %v350_v25 = vmul.f32 %v304_v19, %v304_v19  ;;  %v326_v32 = vsel %vm256_vm0, %v304_v19, 0.0 }
  0xac   : > { %v348_v21 = vmul.f32 %v298_v18, %v298_v18  ;;  %v323_v24 = vsel %vm256_vm0, %v298_v18, 0.0 }
  0xad   : > { %v359_v37 = vsel %vm256_vm0, %v350_v25, 0.0 }
  0xae   : > { %v356_v31 = vsel %vm256_vm0, %v348_v21, 0.0 }
  0xb1   : > { %v316_v22 = vpop.f32.mrf.mxu3 }
  0xb2   : > { %v310_v20 = vpop.f32.mrf.mxu2  ;;  %v307_v28 = vpop.f32.mrf.mxu1  ;;  %v354_v50 = vmul.f32 %v316_v22, %v316_v22  ;;  %v334_v55 = vsel %vm256_vm0, %v316_v22, 0.0 }
  0xb3   : > { %v301_v23 = vpop.f32.mrf.mxu0  ;;  %v351_v30 = vmul.f32 %v307_v28, %v307_v28  ;;  %v328_v34 = vsel %vm256_vm0, %v307_v28, 0.0  ;;  %v352_v38 = vmul.f32 %v310_v20, %v310_v20  ;;  %v330_v43 = vsel %vm256_vm0, %v310_v20, 0.0 }
  0xb4   : > { %v324_v26 = vsel %vm256_vm0, %v301_v23, 0.0  ;;  %v349_v27 = vmul.f32 %v301_v23, %v301_v23  ;;  %v367_v59 = vsel %vm256_vm0, %v354_v50, 0.0 }
  0xb5   : > { %v325_v29 = vadd.f32 %v324_v26, %v323_v24  ;;  %v361_v39 = vsel %vm256_vm0, %v351_v30, 0.0  ;;  %v363_v49 = vsel %vm256_vm0, %v352_v38, 0.0 }
  0xb6   : > { %v357_v33 = vsel %vm256_vm0, %v349_v27, 0.0 }
  0xb7   : > { %v358_v35 = vadd.f32 %v357_v33, %v356_v31  ;;  %v327_v36 = vadd.f32 %v326_v32, %v325_v29 }
  0xb9   : > { %v329_v40 = vadd.f32 %v328_v34, %v327_v36  ;;  %v360_v41 = vadd.f32 %v359_v37, %v358_v35  ;;  %v319_v46 = vpop.f32.mrf.mxu3 }
  0xba   : > { %v313_v42 = vpop.f32.mrf.mxu2  ;;  %v355_v52 = vmul.f32 %v319_v46, %v319_v46  ;;  %v336_v56 = vsel %vm256_vm0, %v319_v46, 0.0 }
  0xbb   : > { %v332_v44 = vsel %vm256_vm0, %v313_v42, 0.0  ;;  %v353_v45 = vmul.f32 %v313_v42, %v313_v42  ;;  %v362_v47 = vadd.f32 %v361_v39, %v360_v41  ;;  %v331_v48 = vadd.f32 %v330_v43, %v329_v40 }
  0xbc   : > { %v369_v60 = vsel %vm256_vm0, %v355_v52, 0.0 }
  0xbd   : > { %v365_v51 = vsel %vm256_vm0, %v353_v45, 0.0  ;;  %v333_v53 = vadd.f32 %v332_v44, %v331_v48  ;;  %v364_v54 = vadd.f32 %v363_v49, %v362_v47 }
  0xbf   : > { %v366_v57 = vadd.f32 %v365_v51, %v364_v54  ;;  %v335_v58 = vadd.f32 %v334_v55, %v333_v53 }
  0xc1   : > { %v337_v61 = vadd.f32 %v336_v56, %v335_v58  ;;  %v368_v62 = vadd.f32 %v367_v59, %v366_v57 }
  0xc3   : > { %v338_v63 = vrot.slane %v337_v61, 4  ;;  %v370_v0 = vadd.f32 %v369_v60, %v368_v62 }
  0xc5   : > { %v339_v1 = vadd.f32 %v338_v63, %v337_v61  ;;  %v371_v2 = vrot.slane %v370_v0, 4 }
  0xc7   : > { %v340_v3 = vrot.slane %v339_v1, 2  ;;  %v372_v4 = vadd.f32 %v371_v2, %v370_v0 }
  0xc9   : > { %v341_v5 = vadd.f32 %v340_v3, %v339_v1  ;;  %v373_v6 = vrot.slane %v372_v4, 2 }
  0xcb   : > { %v342_v7 = vrot.slane %v341_v5, 1  ;;  %v374_v8 = vadd.f32 %v373_v6, %v372_v4 }
  0xcd   : > { %v343_v10 = vadd.f32 %v342_v7, %v341_v5  ;;  %v375_v11 = vrot.slane %v374_v8, 1 }
  0xcf   : > { %v344_v13 = vadd.f32 %v343_v10, %v322_v9  ;;  %v376_v14 = vadd.f32 %v375_v11, %v374_v8 }
  0xd1   : > { %346 = vst.msk [vmem:[%s956_s1] sm:$0x1] %vm236_vm1, %v344_v13  ;;  %v377_v15 = vadd.f32 %v376_v14, %v347_v12 }
  0xd2   : > { %717 = shalt.err (!%p714_p1)
}
  0xd3   : > { %555 = dma.vmem_to_hbm [thread:$0]  (%p886_p8), %s395_s19, 16, %s397_s22, %s380_s15   ;;  %378 = vst.msk [vmem:[%s961_s21] sm:$0x1] %vm236_vm1, %v377_v15 }
  0xd4   : > { %s384_s1 = scalar_lea.sflag [#allocation9], %s935_s9  ;;  %s732_s5 = sshra.s32 %s410_s30, 4  ;;  %s733_s5 = int_to_ptr.hbm [resolvable:$true] %s732_s5 }
  0xd5   : > { %s734_s7 = scalar_lea.hbm %s733_s5, 1  ;;  %s738_s28 = scalar_lea.hbm %s1058_s3, 2 }
  0xd6   : > { %p735_p2 = scmp.ne.s32.totalorder %s733_s5, %s734_s7  ;;  %p739_p10 = scmp.lt.s32.totalorder %s733_s5, %s1058_s3 }
  0xd7   : > { %p740_p3 = scmp.lt.s32.totalorder %s738_s28, %s734_s7 }
  0xd8   : > { %p736_p4 = pnand %p735_p2, %p886_p8 }
  0xd9   : > { %p741_p5 = por %p740_p3, %p739_p10 }
  0xda   : > { %p737_p6 = pneg %p736_p4 }
  0xdc   : > { %p742_p7 = pnand %p741_p5, %p737_p6 }
  0xde   : > { %745 = shalt.err (!%p742_p7)
}
  0xdf   : > { %556 = dma.vmem_to_hbm [thread:$0]  (%p886_p8), %s1000_s26, 16, %s410_s30, %s384_s1  }
  0xe0 PF: > { %s421_s9 = sand.u32 1, %s788_s12   ;;  %p568_p11 = pnand %p528_p13, %p890_p9 }
  0xe1   : > { %s422_s21 = scalar_lea.sflag [#allocation4], %s421_s9 }
  0xe2   : > { %p569_p12 = pneg %p568_p11 }
  0xe4   : > { %779 = dma.done.wait (%p569_p12), %s422_s21, 16  }
  0xe5   : > { %781 = vsyncadd (%p569_p12), %s422_s21, 4294967280  ;;  %s431_s19 = scalar_lea.sflag [#allocation9], %s421_s9 }
  0xe6   : > { %783 = dma.done.wait (%p569_p12), %s431_s19, 16  }
  0xe7   : > { %785 = vsyncadd (%p569_p12), %s431_s19, 4294967280  ;;  %s24_s17 = sadd.s32 1, %s808_s17   ;;  %s1068_s12 = smov %s792_s13 }
  0xe8   : > { %p21_p0 = scmp.ge.s32.totalorder %s24_s17, 4   ;;  %s1069_s13 = smov %s796_s14 }
  0xe9   : > { %s1070_s14 = smov %s928_s27  ;;  %s1071_s15 = smov %s804_s16 }
  0xea   : > { %s1072_s16 = smov %s1074_s6  ;;  %23 = sbr.rel (!%p21_p0) target bundleno = 11 (0xb), region = 98 }
  0xef   :  { %436 = vsyncpa [#allocation3], 1 }
  0xf0   :  { %438 = vsyncpa [#allocation3 + $0x1], 1 }
  0xf1   :  { %439 = vsyncpa [#allocation6], 1 }
  0xf2   :  { %440 = vsyncpa [#allocation4], 1 }
  0xf3   :  { %442 = vsyncpa [#allocation4 + $0x1], 1 }
  0xf4   :  { %443 = vsyncpa [#allocation9], 1 }
  0xf5   :  { %445 = vsyncpa [#allocation9 + $0x1], 1 }

</bundles_post_ra>
